<compile_context>
chip_gen: v5e
topology: v5e:2x2
jax: 0.10.0
libtpu: 0.0.40
codegen_flags: <defaults>
</compile_context>

<pallas_src>
import functools

import jax
import jax.numpy as jnp
import numpy as np
from jax.experimental import pallas as pl
from jax.experimental.pallas import tpu as pltpu


# --------------------------------------------------------------------------
# Pallas kernel 1: prompt assembly (the torch.cat([...], dim=1) in forward)
# --------------------------------------------------------------------------
def _assemble_kernel(*refs, per_class_flags):
    """refs = (*segment_refs, out_ref).

    per_class_flags[i] says whether segment i arrives as a class-indexed
    [bt, L, D] block (True) or as the full shared [L, D] array (False, the
    unsqueeze(0).expand in PyTorch).
    """
    out_ref = refs[-1]
    bt = out_ref.shape[0]
    parts = []
    for ref, per_class in zip(refs[:-1], per_class_flags):
        val = ref[...]
        if not per_class:
            val = jnp.broadcast_to(val[None, :, :], (bt,) + val.shape)
        parts.append(val)
    # One full-width store of the entire [bt, S, D] block: a single unmasked
    # vst stream instead of one masked store + sublane rotate per short segment.
    out_ref[...] = jnp.concatenate(parts, axis=1)


def _choose_block_classes(n_cls, seq_len, ctx_dim, itemsize,
                          vmem_budget_bytes, cap):
    # Double-buffered in+out footprint per class in the assembly pipeline.
    per_class = 2 * 2 * seq_len * ctx_dim * itemsize
    bt = max(1, vmem_budget_bytes // max(per_class, 1))
    bt = int(min(bt, cap, n_cls))
    # Keep the grid length >= 2 so the "parallel" axis can actually be split
    # across the two TensorCores on v7x (and megacore in general).
    if n_cls > 1 and pl.cdiv(n_cls, bt) < 2:
        bt = int(pl.cdiv(n_cls, 2))
    return bt


def assemble_prompts(segments, *, vmem_budget_bytes=20 * 1024 * 1024,
                     class_block_cap=32):
    """segments: list of (array, per_class).  per_class arrays are
    [n_cls, L, D]; shared arrays are [L, D].  Returns [n_cls, S, D]."""
    per_class_arrays = [a for a, pc in segments if pc]
    n_cls = per_class_arrays[0].shape[0]
    ctx_dim = per_class_arrays[0].shape[-1]
    dtype = per_class_arrays[0].dtype
    seq_len = sum(a.shape[1] if pc else a.shape[0] for a, pc in segments)

    bt = _choose_block_classes(n_cls, seq_len, ctx_dim,
                               jnp.dtype(dtype).itemsize,
                               vmem_budget_bytes, class_block_cap)
    grid = (pl.cdiv(n_cls, bt),)          # partial edge block is fine

    arrays, in_specs, flags = [], [], []
    for a, pc in segments:
        arrays.append(a)
        flags.append(pc)
        if pc:
            in_specs.append(pl.BlockSpec((bt, a.shape[1], ctx_dim),
                                         lambda b: (b, 0, 0)))
        else:
            in_specs.append(pl.BlockSpec(a.shape, lambda b: (0, 0)))

    return pl.pallas_call(
        functools.partial(_assemble_kernel, per_class_flags=tuple(flags)),
        out_shape=jax.ShapeDtypeStruct((n_cls, seq_len, ctx_dim), dtype),
        grid=grid,
        in_specs=in_specs,
        out_specs=pl.BlockSpec((bt, seq_len, ctx_dim), lambda b: (b, 0, 0)),
        compiler_params=pltpu.CompilerParams(
            dimension_semantics=("parallel",),
            vmem_limit_bytes=48 * 1024 * 1024),
    )(*arrays)


# --------------------------------------------------------------------------
# Pallas kernel 2: proj(ctx) + all compound_prompt_projections in ONE step
# --------------------------------------------------------------------------
def _proj_only_kernel(x_ref, w_ref, b_ref, o_ref):
    y = jnp.dot(x_ref[...].astype(jnp.float32), w_ref[...].astype(jnp.float32),
                preferred_element_type=jnp.float32)
    o_ref[...] = (y + b_ref[...].astype(jnp.float32)).astype(o_ref.dtype)


def _projection_kernel(ctx_ref, comp_ref, pw_ref, pb_ref, cw_ref, cb_ref,
                       shared_ref, vis_ref):
    # shared_ctx = ctx @ proj_w + proj_b   (f32 MXU accumulation)
    x = ctx_ref[...].astype(jnp.float32)
    w = pw_ref[...].astype(jnp.float32)
    y = jnp.dot(x, w, preferred_element_type=jnp.float32)
    shared_ref[...] = (y + pb_ref[...].astype(jnp.float32)).astype(shared_ref.dtype)

    # visual_deep_prompts[i] = compound_prompts_text[i] @ W_i + b_i
    # depth-1 is tiny (<= ~11 for CLIP) -> static unroll; the whole bf16 weight
    # stack already sits in VMEM so the DMAs overlap the tiny MXU calls.
    for p in range(comp_ref.shape[0]):
        xp = comp_ref[p].astype(jnp.float32)
        wp = cw_ref[p].astype(jnp.float32)
        yp = jnp.dot(xp, wp, preferred_element_type=jnp.float32)
        vis_ref[p] = (yp + cb_ref[p].astype(jnp.float32)).astype(vis_ref.dtype)


def run_projections(ctx, comp_stacked, proj_w, proj_b, comp_w, comp_b,
                    out_dtype=jnp.float32):
    """ctx: [n_ctx, K] f32; comp_stacked: [P-1, n_ctx, K] f32;
    proj_w: [K, N] bf16; comp_w: [P-1, K, N] bf16; biases f32."""
    n_ctx, K = ctx.shape
    N = proj_w.shape[-1]
    P1 = comp_stacked.shape[0]
    cp = pltpu.CompilerParams(vmem_limit_bytes=32 * 1024 * 1024)

    if P1 == 0:
        shared = pl.pallas_call(
            _proj_only_kernel,
            out_shape=jax.ShapeDtypeStruct((n_ctx, N), out_dtype),
            compiler_params=cp,
        )(ctx, proj_w, proj_b.reshape(1, N))
        return shared, []

    shared, vis = pl.pallas_call(
        _projection_kernel,
        out_shape=(jax.ShapeDtypeStruct((n_ctx, N), out_dtype),
                   jax.ShapeDtypeStruct((P1, n_ctx, N), out_dtype)),
        compiler_params=cp,
    )(ctx, comp_stacked, proj_w, proj_b.reshape(1, N),
      comp_w, comp_b.reshape(P1, 1, N))
    return shared, [vis[i] for i in range(P1)]


# --------------------------------------------------------------------------
# MultiModalPromptLearner forward (Pallas kernels + static-config glue)
# --------------------------------------------------------------------------
def multimodal_prompt_learner_forward(params, cfg):
    use_atp = cfg["use_atp"]
    atp_num = cfg.get("atp_num", 0)

    prefix = params["token_prefix"]                              # [n_cls, 1, D]
    suffix = params["token_suffix"]                              # [n_cls, L_suf, D]
    ctx = params["ctx"]                                          # [n_ctx, D]

    # construct_prompts(): segment order matches the PyTorch torch.cat order.
    segments = [(prefix, True)]
    if use_atp:
        segments += [(params["ctx_att1"], False), (params["token_middle1"], True)]
        if atp_num >= 2:
            segments += [(params["ctx_att2"], False), (params["token_middle2"], True)]
        if atp_num >= 3:
            segments += [(params["ctx_att3"], False), (params["token_middle3"], True)]
    segments += [(ctx, False), (suffix, True)]
    prompts = assemble_prompts(segments)

    # self.proj(self.ctx) + all compound projections, one kernel, no weight concat.
    comp = params["compound_prompts_text"]                       # [depth-1, n_ctx, D]
    shared_ctx, visual_deep_prompts = run_projections(
        ctx, comp, params["proj_w"], params["proj_b"],
        params["compound_proj_w"], params["compound_proj_b"],
        out_dtype=ctx.dtype)

    comp_list = [comp[i] for i in range(comp.shape[0])]
    return prompts, shared_ctx, comp_list, visual_deep_prompts


# --------------------------------------------------------------------------
# Pure-JAX reference (mirrors the PyTorch forward)
# --------------------------------------------------------------------------
def reference_forward(params, cfg):
    use_atp = cfg["use_atp"]
    atp_num = cfg.get("atp_num", 0)
    n_cls = params["token_prefix"].shape[0]
    bcast = lambda a: jnp.broadcast_to(a[None], (n_cls,) + a.shape)

    parts = [params["token_prefix"]]
    if use_atp:
        parts += [bcast(params["ctx_att1"]), params["token_middle1"]]
        if atp_num >= 2:
            parts += [bcast(params["ctx_att2"]), params["token_middle2"]]
        if atp_num >= 3:
            parts += [bcast(params["ctx_att3"]), params["token_middle3"]]
    parts += [bcast(params["ctx"]), params["token_suffix"]]
    prompts = jnp.concatenate(parts, axis=1)

    f32 = jnp.float32
    shared = (params["ctx"].astype(f32) @ params["proj_w"].astype(f32)
              + params["proj_b"].astype(f32))
    comp = params["compound_prompts_text"]
    visual = [comp[i].astype(f32) @ params["compound_proj_w"][i].astype(f32)
              + params["compound_proj_b"][i].astype(f32)
              for i in range(comp.shape[0])]
    comp_list = [comp[i] for i in range(comp.shape[0])]
    return prompts, shared, comp_list, visual


# --------------------------------------------------------------------------
# Deterministic parameter init (shapes implied by the module)
# --------------------------------------------------------------------------
def init_params(key, *, n_cls, n_ctx, ctx_dim, vis_dim, seq_len, depth,
                use_atp, atp_num, n_att1=2, n_att2=2, n_att3=2):
    used = 1 + n_ctx
    if use_atp:
        if atp_num >= 1:
            used += n_att1 + 1
        if atp_num >= 2:
            used += n_att2 + 1
        if atp_num >= 3:
            used += n_att3 + 1
    suffix_len = seq_len - used
    assert suffix_len > 0

    ks = jax.random.split(key, 20)
    nrm = lambda k, shape, s=0.02: (s * jax.random.normal(k, shape)).astype(jnp.float32)
    nrm_bf16 = lambda k, shape, s=0.02: (s * jax.random.normal(k, shape)).astype(jnp.bfloat16)

    # _get_clones deep-copies one Linear -> all compound projections share init.
    shared_proj_w = nrm_bf16(ks[8], (ctx_dim, vis_dim))
    params = dict(
        token_prefix=nrm(ks[0], (n_cls, 1, ctx_dim)),
        token_suffix=nrm(ks[1], (n_cls, suffix_len, ctx_dim)),
        ctx=nrm(ks[2], (n_ctx, ctx_dim)),
        # Linear(ctx_dim, 768).weight.T, stored bf16 (halves the weight DMA).
        proj_w=nrm_bf16(ks[3], (ctx_dim, vis_dim)),
        proj_b=nrm(ks[15], (vis_dim,), 0.01),
        # NOTE: the PyTorch module hard-codes 512 here; for real CLIP ctx_dim==512.
        compound_prompts_text=nrm(ks[4], (depth - 1, n_ctx, ctx_dim)),
        # Pre-stacked at init: no per-forward weight concatenation.
        compound_proj_w=jnp.broadcast_to(
            shared_proj_w[None], (depth - 1, ctx_dim, vis_dim)).copy(),
        compound_proj_b=nrm(ks[16], (depth - 1, vis_dim), 0.01),
    )
    if use_atp:
        params.update(
            ctx_att1=nrm(ks[9], (n_att1, ctx_dim), 0.01),
            ctx_att2=nrm(ks[10], (n_att2, ctx_dim), 0.01),
            ctx_att3=nrm(ks[11], (n_att3, ctx_dim), 0.01),
            token_middle1=nrm(ks[12], (n_cls, 1, ctx_dim)),
            token_middle2=nrm(ks[13], (n_cls, 1, ctx_dim)),
            token_middle3=nrm(ks[14], (n_cls, 1, ctx_dim)),
        )
    return params


# --------------------------------------------------------------------------
if __name__ == "__main__":
    n_ctx, ctx_dim, vis_dim, seq_len, depth = 2, 32, 64, 16, 3
    key = jax.random.PRNGKey(0)

    # (use_atp, atp_num, n_cls): n_cls=5 exercises the non-divisible (partial
    # edge block) tiling path fixed per the perf review.
    for use_atp, atp_num, n_cls in [(False, 0, 2), (True, 2, 5), (True, 3, 4)]:
        cfg = dict(use_atp=use_atp, atp_num=atp_num)
        params = init_params(key, n_cls=n_cls, n_ctx=n_ctx, ctx_dim=ctx_dim,
                             vis_dim=vis_dim, seq_len=seq_len, depth=depth,
                             use_atp=use_atp, atp_num=atp_num,
                             n_att1=2, n_att2=2, n_att3=2)

        out = multimodal_prompt_learner_forward(params, cfg)
        out = jax.block_until_ready(out)
        ref = reference_forward(params, cfg)

        prompts, shared_ctx, comp, visual = out
        r_prompts, r_shared, r_comp, r_visual = ref

        assert prompts.shape == (n_cls, seq_len, ctx_dim)
        assert shared_ctx.shape == (n_ctx, vis_dim)
        # Assembly is pure data movement -> bitwise.
        np.testing.assert_array_equal(np.asarray(prompts), np.asarray(r_prompts))
        np.testing.assert_allclose(np.asarray(shared_ctx), np.asarray(r_shared),
                                   rtol=2e-2, atol=5e-4)
        assert len(visual) == depth - 1
        for v, rv in zip(visual, r_visual):
            assert v.shape == (n_ctx, vis_dim)
            np.testing.assert_allclose(np.asarray(v), np.asarray(rv),
                                       rtol=2e-2, atol=5e-4)
        for c, rc in zip(comp, r_comp):
            np.testing.assert_array_equal(np.asarray(c), np.asarray(rc))
        assert all(bool(jnp.all(jnp.isfinite(a)))
                   for a in [prompts, shared_ctx] + visual)

    print("KERNEL_OK")
</pallas_src>

<mosaic_0001>
module attributes {stable_mosaic.version = 11 : i64} {
  func.func @_assemble_kernel(%arg0: i32, %arg1: memref<1x1x32xf32, #tpu.memory_space<vmem>>, %arg2: memref<2x32xf32, #tpu.memory_space<vmem>>, %arg3: memref<1x13x32xf32, #tpu.memory_space<vmem>>, %arg4: memref<1x16x32xf32, #tpu.memory_space<vmem>>) attributes {dimension_semantics = [#tpu.dimension_semantics<parallel>], iteration_bounds = array<i64: 2>, scalar_prefetch = 0 : i64, scratch_operands = 0 : i64, tpu.core_type = #tpu.core_type<tc>, window_params = [{transform_indices = @transform_0, window_bounds = array<i64: 1, 1, 32>}, {pipeline_mode = #tpu.pipeline_mode<synchronous>, transform_indices = @transform_1, window_bounds = array<i64: 2, 32>}, {transform_indices = @transform_2, window_bounds = array<i64: 1, 13, 32>}, {transform_indices = @transform_3, window_bounds = array<i64: 1, 16, 32>}]} {
    %c0 = arith.constant 0 : index
    %c0_0 = arith.constant 0 : index
    %c0_1 = arith.constant 0 : index
    %0 = vector.load %arg1[%c0, %c0_0, %c0_1] : memref<1x1x32xf32, #tpu.memory_space<vmem>>, vector<1x1x32xf32>
    %c0_2 = arith.constant 0 : index
    %c0_3 = arith.constant 0 : index
    %1 = vector.load %arg2[%c0_2, %c0_3] : memref<2x32xf32, #tpu.memory_space<vmem>>, vector<2x32xf32>
    %2 = vector.shape_cast %1 : vector<2x32xf32> to vector<1x2x32xf32>
    %c0_4 = arith.constant 0 : index
    %c0_5 = arith.constant 0 : index
    %c0_6 = arith.constant 0 : index
    %3 = vector.load %arg3[%c0_4, %c0_5, %c0_6] : memref<1x13x32xf32, #tpu.memory_space<vmem>>, vector<1x13x32xf32>
    %4 = tpu.concatenate %0, %2, %3 in 1 : vector<1x1x32xf32>, vector<1x2x32xf32>, vector<1x13x32xf32> -> vector<1x16x32xf32>
    %c0_7 = arith.constant 0 : index
    %c0_8 = arith.constant 0 : index
    %c0_9 = arith.constant 0 : index
    %5 = vector.load %arg4[%c0_7, %c0_8, %c0_9] : memref<1x16x32xf32, #tpu.memory_space<vmem>>, vector<1x16x32xf32>
    tpu.vector_store %arg4[%c0_7, %c0_8, %c0_9], %4 {strides = array<i32>} : memref<1x16x32xf32, #tpu.memory_space<vmem>>, vector<1x16x32xf32>,
    return
  }
  func.func @transform_0(%arg0: i32) -> (i32, i32, i32) {
    %c0_i32 = arith.constant 0 : i32
    %c0_i32_0 = arith.constant 0 : i32
    %c0_i32_1 = arith.constant 0 : i32
    return %arg0, %c0_i32, %c0_i32_0 : i32, i32, i32
  }
  func.func @transform_1(%arg0: i32) -> (i32, i32) {
    %c0_i32 = arith.constant 0 : i32
    %c0_i32_0 = arith.constant 0 : i32
    %c0_i32_1 = arith.constant 0 : i32
    return %c0_i32, %c0_i32_0 : i32, i32
  }
  func.func @transform_2(%arg0: i32) -> (i32, i32, i32) {
    %c0_i32 = arith.constant 0 : i32
    %c0_i32_0 = arith.constant 0 : i32
    %c0_i32_1 = arith.constant 0 : i32
    return %arg0, %c0_i32, %c0_i32_0 : i32, i32, i32
  }
  func.func @transform_3(%arg0: i32) -> (i32, i32, i32) {
    %c0_i32 = arith.constant 0 : i32
    %c0_i32_0 = arith.constant 0 : i32
    %c0_i32_1 = arith.constant 0 : i32
    return %arg0, %c0_i32, %c0_i32_0 : i32, i32, i32
  }
}

</mosaic_0001>

<bundles_post_ra>
// kernel: tpu_custom_call.1
= control target key start
LH: loop header
LB: loop body
LE: loop exit
PB: predicated region body
PF: predicated region fallthrough
CT: control target
= control target key end

     0   :  { %8 = vsyncpa [#allocation3], 0  ;;  %s517_s0 = inlined_call_operand.vmem [shape: f32[2,1,32], index: 0, kind: input, shape index: {}]   ;;  %s518_s1 = inlined_call_operand.vmem [shape: f32[2,32], index: 1, kind: input, shape index: {}]   ;;  %s519_s2 = inlined_call_operand.vmem [shape: f32[2,13,32], index: 2, kind: input, shape index: {}]   ;;  %s520_s3 = inlined_call_operand.hbm [shape: f32[2,16,32], index: 3, kind: output, shape index: {}]  }
   0x1   :  { %10 = vsyncpa [#allocation3 + $0x1], 0  ;;  %s432_s12 = smov 0   ;;  %s434_s13 = smov 0  }
   0x2   :  { %s436_s14 = smov 0   ;;  %s438_s15 = smov 0  }
   0x3 LB: > { %s290_s16 = sadd.s32 4294967295, %s408_s15   ;;  %s291_s17 = sadd.s32 4294967294, %s408_s15   ;;  %s408_s15 = sphi %s438_s15, %s526_s15   ;;  %s404_s14 = sphi %s436_s14, %s525_s14   ;;  %s400_s13 = sphi %s434_s13, %s524_s13   ;;  %s396_s12 = sphi %s432_s12, %s523_s12  }
   0x4   : > { %s455_s18 = sadd.s32 1, %s408_s15   ;;  %s96_s19 = sadd.s32 1, %s404_s14 }
   0x5   : > { %s93_s20 = ssub.s32 %s408_s15, %s455_s18  ;;  %p106_p0 = scmp.ne.s32.totalorder %s404_s14, %s400_s13 }
   0x6   : > { %p94_p1 = scmp.eq.s32.totalorder %s93_s20, 0  ;;  %p107_p2 = scmp.eq.s32.totalorder %s290_s16, 1 }
   0x7   : > { %p112_p3 = scmp.ne.s32.totalorder %s400_s13, %s396_s12  ;;  %p113_p4 = scmp.eq.s32.totalorder %s291_s17, 1 }
   0x8   : > { %s465_s21 = scalar_select %p94_p1, %s404_s14, %s96_s19  }
   0x9   : > { %p467_p5 = por %p107_p2, %p106_p0  ;;  %p471_p6 = por %p113_p4, %p112_p3 }
   0xa   : > { %p294_p7 = scmp.ge.s32.totalorder %s408_s15, 1  ;;  %p148_p8 = scmp.lt.s32.totalorder %s408_s15, 3 }
   0xc   : > { %p149_p9 = pnand %p294_p7, %p148_p8 }
   0xd   : > { %s172_s24 = sand.u32 (!%p149_p9), 1, %s400_s13   ;;  %p175_p10 = scmp.lt.s32.totalorder (!%p149_p9), %s290_s16, 1 }
   0xe   : > { %152 = sbr.rel (%p149_p9) target bundleno = 34 (0x22), region = 32  ;;  %s295_s27 = sshll.u32 (!%p149_p9), %s172_s24, 4 }
   0xf   : > { %s304_s28 = sshll.u32 (!%p149_p9), %s290_s16, 4  ;;  %s174_s17 = scalar_lea.vmem (!%p149_p9), [#allocation2], %s295_s27 }
  0x10   : > { %s216_s4 = scalar_lea.hbm (!%p149_p9), %s520_s3, %s304_s28  ;;  %s217_s19 = sshll.u32 (!%p149_p9), %s174_s17, 4  ;;  %s218_s19 = int_to_ptr.vmem [resolvable:$true] %s217_s19 }
  0x11   : > { %s219_s20 = sshll.u32 (!%p149_p9), %s216_s4, 4  ;;  %s366_s29 = scalar_lea.hbm (!%p149_p9), %s520_s3, 32  ;;  %s220_s20 = int_to_ptr.hbm [resolvable:$true] %s219_s20 }
  0x12   : > { %s360_s25 = sshra.s32 (!%p149_p9), %s220_s20, 4  ;;  %s361_s25 = int_to_ptr.hbm [resolvable:$true] %s360_s25 }
  0x13   : > { %v184_v0 = vld [vmem:[%s518_s1] sm:$0x3]  ;;  %s528_s16 = smov (!%p175_p10, %s290_s16), 1  ;;  %vm198_vm0 = vcmask 1040384   ;;  %vm192_vm1 = vcmask 1042432   ;;  %vm201_vm2 = vcmask 261120   ;;  %p367_p0 = scmp.lt.s32.totalorder %s361_s25, %s520_s3 }
  0x14   : > { %v188_v1 = vrot.slane %v184_v0, 7  ;;  %s177_s7 = scalar_lea.vmem %s517_s0, %s528_s16  ;;  %s303_s8 = sshll.u32 %s528_s16, 4 }
  0x15   : > { %s182_s11 = scalar_lea.vmem %s519_s2, %s303_s8  ;;  %v183_v2 = vld [vmem:[%s177_s7] sm:$0x1]  ;;  %s205_s16 = scalar_lea.sflag [#allocation3], %s172_s24 }
  0x16   : > { %v185_v3 = vld [vmem:[%s182_s11] sm:$0xff]  ;;  %v199_v4 = vsel %vm198_vm0, %v183_v2, %v188_v1  ;;  %v186_v5 = vld [vmem:[%s182_s11 + $0x8] sm:$0x1f]  ;;  %s362_s26 = scalar_lea.hbm %s361_s25, 16 }
  0x17   : > { %v193_v6 = vrot.slane %v185_v3, 5  ;;  %v194_v7 = vrot.slane %v186_v5, 5  ;;  %p363_p11 = scmp.ne.s32.totalorder %s361_s25, %s362_s26  ;;  %p368_p1 = scmp.lt.s32.totalorder %s366_s29, %s362_s26 }
  0x19   : > { %v200_v8 = vsel %vm192_vm1, %v199_v4, %v193_v6  ;;  %v195_v9 = vsel %vm192_vm1, %v193_v6, %v194_v7  ;;  %p364_p12 = pnand %p363_p11, %p467_p5  ;;  %p369_p2 = por %p368_p1, %p367_p0 }
  0x1a   : > { %202 = vst.msk [vmem:[%s174_s17] sm:$0xff] %vm201_vm2, %v200_v8 }
  0x1b   : > { %203 = vst.msk [vmem:[%s174_s17 + $0x8] sm:$0xff] %vm201_vm2, %v195_v9  ;;  %p365_p13 = pneg %p364_p12 }
  0x1d   : > { %p370_p3 = pnand %p369_p2, %p365_p13 }
  0x1f   : > { %373 = shalt.err (!%p370_p3)
}
  0x20   : > { %s410_s24 = smov 128   ;;  %s411_s5 = smov 8  }
  0x21   : > { %305 = dma.vmem_to_hbm [thread:$0]  (%p467_p5), %s218_s19, 256, %s220_s20, %s205_s16, %s410_s24, %s410_s24, %s411_s5  }
  0x22 PF: > { %p311_p4 = scmp.ge.s32.totalorder %s408_s15, 2  ;;  %s234_s6 = sand.u32 1, %s396_s12  }
  0x23   : > { %s235_s7 = scalar_lea.sflag [#allocation3], %s234_s6 }
  0x24   : > { %p308_p7 = pnand %p311_p4, %p471_p6 }
  0x26   : > { %p309_p8 = pneg %p308_p7 }
  0x28   : > { %391 = dma.done.wait (%p309_p8), %s235_s7, 256  }
  0x29   : > { %393 = vsyncadd (%p309_p8), %s235_s7, 4294967040  ;;  %p13_p9 = scmp.ge.s32.totalorder %s455_s18, 4   ;;  %s523_s12 = smov %s400_s13 }
  0x2a   : > { %s524_s13 = smov %s404_s14  ;;  %s525_s14 = smov %s465_s21 }
  0x2b   : > { %s526_s15 = smov %s455_s18  ;;  %15 = sbr.rel (!%p13_p9) target bundleno = 3 (0x3), region = 70 }
  0x30   :  { %241 = vsyncpa [#allocation3], 1 }
  0x31   :  { %243 = vsyncpa [#allocation3 + $0x1], 1 }

</bundles_post_ra>
